<compile_context>
chip_gen: v5e
topology: v5e:2x2
jax: 0.10.0
libtpu: 0.0.40
codegen_flags: <defaults>
</compile_context>

<pallas_src>
import math

import jax
import jax.numpy as jnp
from jax.experimental import pallas as pl
from jax.experimental.pallas import tpu as pltpu

HEAD_PAD = 8  # pad the 1-wide head to 8 sublanes (native f32 sublane tile)


def _round_up(x, m):
    return ((x + m - 1) // m) * m


def modelt_kernel(zt_ref, w1t_ref, b1_ref, w2t_ref, b2_ref, w3t_ref, b3_ref, out_ref):
    # Batch lives on the lane (minor) axis throughout.
    # Layer 1: (256, Z_dim)bf16 @ (Z_dim, bm)bf16 -> f32 acc; bias+ReLU in f32.
    h1 = jnp.dot(w1t_ref[...], zt_ref[...], preferred_element_type=jnp.float32)
    h1 = jnp.maximum(h1 + b1_ref[...], 0.0)              # (256,1) bcast over lanes
    # Layer 2: (128, 256) @ (256, bm) -> f32 acc.
    h2 = jnp.dot(w2t_ref[...], h1.astype(jnp.bfloat16),
                 preferred_element_type=jnp.float32)
    h2 = jnp.maximum(h2 + b2_ref[...], 0.0)
    # Head, padded to 8 rows: (8, 128) @ (128, bm) -> (8, bm); row 0 = logits.
    logits = jnp.dot(w3t_ref[...], h2.astype(jnp.bfloat16),
                     preferred_element_type=jnp.float32)
    out_ref[...] = (logits + b3_ref[...]).astype(out_ref.dtype)


def modelt_forward(z, params, *, block_m=512):
    """z: (B, Z_dim) float32; params: dict w1,b1,w2,b2,w3,b3 stored as
    (in_features, out_features) weights / (1, out) biases. Returns (B,) f32."""
    w1, b1 = params["w1"], params["b1"]
    w2, b2 = params["w2"], params["b2"]
    w3, b3 = params["w3"], params["b3"]
    B, Z_dim = z.shape
    n_out = w3.shape[1]  # == 1 for Modelt

    # Transposed weights (out, in), bf16 for the MXU; head padded to 8 rows.
    w1t = w1.T.astype(jnp.bfloat16)                                    # (256, Z_dim)
    w2t = w2.T.astype(jnp.bfloat16)                                    # (128, 256)
    w3t = jnp.pad(w3.T, ((0, HEAD_PAD - n_out), (0, 0))).astype(jnp.bfloat16)  # (8, 128)
    # Biases as (out, 1) f32 columns (broadcast over the lane/batch axis).
    b1t = b1.reshape(-1, 1)                                            # (256, 1)
    b2t = b2.reshape(-1, 1)                                            # (128, 1)
    b3t = jnp.pad(b3.reshape(-1, 1), ((0, HEAD_PAD - n_out), (0, 0)))  # (8, 1)

    # Batch goes to the lane axis: Z^T, zero-padded to a multiple of the tile.
    bm = min(block_m, _round_up(B, 128))
    B_pad = _round_up(B, bm)
    zt = z.T.astype(jnp.bfloat16)                                      # (Z_dim, B)
    if B_pad != B:
        zt = jnp.pad(zt, ((0, 0), (0, B_pad - B)))

    grid = (B_pad // bm,)
    out = pl.pallas_call(
        modelt_kernel,
        out_shape=jax.ShapeDtypeStruct((HEAD_PAD, B_pad), jnp.float32),
        grid_spec=pltpu.PrefetchScalarGridSpec(
            num_scalar_prefetch=0,
            grid=grid,
            in_specs=[
                # batch tile of Z^T (lane-major batch)
                pl.BlockSpec((Z_dim, bm), lambda i: (0, i)),
                # full, grid-invariant weight / bias blocks
                pl.BlockSpec(w1t.shape, lambda i: (0, 0)),
                pl.BlockSpec(b1t.shape, lambda i: (0, 0)),
                pl.BlockSpec(w2t.shape, lambda i: (0, 0)),
                pl.BlockSpec(b2t.shape, lambda i: (0, 0)),
                pl.BlockSpec(w3t.shape, lambda i: (0, 0)),
                pl.BlockSpec(b3t.shape, lambda i: (0, 0)),
            ],
            out_specs=pl.BlockSpec((HEAD_PAD, bm), lambda i: (0, i)),
        ),
        compiler_params=pltpu.CompilerParams(dimension_semantics=("parallel",)),
    )(zt, w1t, b1t, w2t, b2t, w3t, b3t)

    # Row 0 holds the logits; drop batch padding -> (B,) == squeeze(-1).
    return out[0, :B]


def xavier_uniform(key, fan_in, fan_out, dtype=jnp.float32):
    # Matches torch.nn.init.xavier_uniform_ (gain=1) for nn.Linear(fan_in, fan_out).
    limit = math.sqrt(6.0 / (fan_in + fan_out))
    return jax.random.uniform(key, (fan_in, fan_out), dtype=dtype,
                              minval=-limit, maxval=limit)


def init_modelt_params(key, Z_dim):
    k1, k2, k3 = jax.random.split(key, 3)
    return {
        "w1": xavier_uniform(k1, Z_dim, 256),
        "b1": jnp.zeros((1, 256), jnp.float32),
        "w2": xavier_uniform(k2, 256, 128),
        "b2": jnp.zeros((1, 128), jnp.float32),
        "w3": xavier_uniform(k3, 128, 1),
        "b3": jnp.zeros((1, 1), jnp.float32),
    }


if __name__ == "__main__":
    key = jax.random.PRNGKey(0)
    k_params, k_z = jax.random.split(key)

    Z_dim = 32
    batch = 8

    params = init_modelt_params(k_params, Z_dim)
    Z = jax.random.normal(k_z, (batch, Z_dim), dtype=jnp.float32)

    out = modelt_forward(Z, params)
    out = jax.block_until_ready(out)

    # Pure-JAX f32 reference of the same forward pass (kernel uses bf16 matmul
    # inputs with f32 accumulation, so tolerance is loosened accordingly).
    h1 = jnp.maximum(Z @ params["w1"] + params["b1"], 0.0)
    h2 = jnp.maximum(h1 @ params["w2"] + params["b2"], 0.0)
    ref = (h2 @ params["w3"] + params["b3"])[:, 0]

    assert out.shape == (batch,)
    assert jnp.allclose(out, ref, atol=5e-2, rtol=5e-2), (
        f"max abs err {jnp.max(jnp.abs(out - ref))}")

    print("KERNEL_OK")
</pallas_src>

<mosaic_0001>
module attributes {stable_mosaic.version = 11 : i64} {
  func.func @modelt_kernel(%arg0: i32, %arg1: memref<32x128xbf16, #tpu.memory_space<vmem>>, %arg2: memref<256x32xbf16, #tpu.memory_space<vmem>>, %arg3: memref<256x1xf32, #tpu.memory_space<vmem>>, %arg4: memref<128x256xbf16, #tpu.memory_space<vmem>>, %arg5: memref<128x1xf32, #tpu.memory_space<vmem>>, %arg6: memref<8x128xbf16, #tpu.memory_space<vmem>>, %arg7: memref<8x1xf32, #tpu.memory_space<vmem>>, %arg8: memref<8x128xf32, #tpu.memory_space<vmem>>) attributes {dimension_semantics = [#tpu.dimension_semantics<parallel>], iteration_bounds = array<i64: 1>, scalar_prefetch = 0 : i64, scratch_operands = 0 : i64, tpu.core_type = #tpu.core_type<tc>, window_params = [{transform_indices = @transform_0, window_bounds = array<i64: 32, 128>}, {pipeline_mode = #tpu.pipeline_mode<synchronous>, transform_indices = @transform_1, window_bounds = array<i64: 256, 32>}, {pipeline_mode = #tpu.pipeline_mode<synchronous>, transform_indices = @transform_2, window_bounds = array<i64: 256, 1>}, {pipeline_mode = #tpu.pipeline_mode<synchronous>, transform_indices = @transform_3, window_bounds = array<i64: 128, 256>}, {pipeline_mode = #tpu.pipeline_mode<synchronous>, transform_indices = @transform_4, window_bounds = array<i64: 128, 1>}, {pipeline_mode = #tpu.pipeline_mode<synchronous>, transform_indices = @transform_5, window_bounds = array<i64: 8, 128>}, {pipeline_mode = #tpu.pipeline_mode<synchronous>, transform_indices = @transform_6, window_bounds = array<i64: 8, 1>}, {transform_indices = @transform_7, window_bounds = array<i64: 8, 128>}]} {
    %c0 = arith.constant 0 : index
    %c0_0 = arith.constant 0 : index
    %0 = vector.load %arg2[%c0, %c0_0] : memref<256x32xbf16, #tpu.memory_space<vmem>>, vector<256x32xbf16>
    %c0_1 = arith.constant 0 : index
    %c0_2 = arith.constant 0 : index
    %1 = vector.load %arg1[%c0_1, %c0_2] : memref<32x128xbf16, #tpu.memory_space<vmem>>, vector<32x128xbf16>
    %cst = arith.constant dense<0.000000e+00> : vector<256x128xf32>
    %2 = tpu.matmul %0, %1, %cst {dimension_numbers = #tpu.dot_dimension_numbers<[1], [0], [0], [1], [0, 0, 1, 1], [], []>} : vector<256x32xbf16>, vector<32x128xbf16>, vector<256x128xf32> -> vector<256x128xf32>
    %c0_3 = arith.constant 0 : index
    %c0_4 = arith.constant 0 : index
    %3 = vector.load %arg3[%c0_3, %c0_4] : memref<256x1xf32, #tpu.memory_space<vmem>>, vector<256x1xf32>
    %4 = vector.broadcast %3 : vector<256x1xf32> to vector<256x128xf32>
    %5 = arith.addf %2, %4 : vector<256x128xf32>
    %cst_5 = arith.constant 0.000000e+00 : f32
    %6 = vector.broadcast %cst_5 : f32 to vector<256x128xf32>
    %7 = arith.maximumf %5, %6 : vector<256x128xf32>
    %c0_6 = arith.constant 0 : index
    %c0_7 = arith.constant 0 : index
    %8 = vector.load %arg4[%c0_6, %c0_7] : memref<128x256xbf16, #tpu.memory_space<vmem>>, vector<128x256xbf16>
    %9 = arith.truncf %7 : vector<256x128xf32> to vector<256x128xbf16>
    %cst_8 = arith.constant dense<0.000000e+00> : vector<128x128xf32>
    %10 = tpu.matmul %8, %9, %cst_8 {dimension_numbers = #tpu.dot_dimension_numbers<[1], [0], [0], [1], [0, 0, 1, 1], [], []>} : vector<128x256xbf16>, vector<256x128xbf16>, vector<128x128xf32> -> vector<128x128xf32>
    %c0_9 = arith.constant 0 : index
    %c0_10 = arith.constant 0 : index
    %11 = vector.load %arg5[%c0_9, %c0_10] : memref<128x1xf32, #tpu.memory_space<vmem>>, vector<128x1xf32>
    %12 = vector.broadcast %11 : vector<128x1xf32> to vector<128x128xf32>
    %13 = arith.addf %10, %12 : vector<128x128xf32>
    %cst_11 = arith.constant 0.000000e+00 : f32
    %14 = vector.broadcast %cst_11 : f32 to vector<128x128xf32>
    %15 = arith.maximumf %13, %14 : vector<128x128xf32>
    %c0_12 = arith.constant 0 : index
    %c0_13 = arith.constant 0 : index
    %16 = vector.load %arg6[%c0_12, %c0_13] : memref<8x128xbf16, #tpu.memory_space<vmem>>, vector<8x128xbf16>
    %17 = arith.truncf %15 : vector<128x128xf32> to vector<128x128xbf16>
    %cst_14 = arith.constant dense<0.000000e+00> : vector<8x128xf32>
    %18 = tpu.matmul %16, %17, %cst_14 {dimension_numbers = #tpu.dot_dimension_numbers<[1], [0], [0], [1], [0, 0, 1, 1], [], []>} : vector<8x128xbf16>, vector<128x128xbf16>, vector<8x128xf32> -> vector<8x128xf32>
    %c0_15 = arith.constant 0 : index
    %c0_16 = arith.constant 0 : index
    %19 = vector.load %arg7[%c0_15, %c0_16] : memref<8x1xf32, #tpu.memory_space<vmem>>, vector<8x1xf32>
    %20 = vector.broadcast %19 : vector<8x1xf32> to vector<8x128xf32>
    %21 = arith.addf %18, %20 : vector<8x128xf32>
    %c0_17 = arith.constant 0 : index
    %c0_18 = arith.constant 0 : index
    %22 = vector.load %arg8[%c0_17, %c0_18] : memref<8x128xf32, #tpu.memory_space<vmem>>, vector<8x128xf32>
    tpu.vector_store %arg8[%c0_17, %c0_18], %21 {strides = array<i32>} : memref<8x128xf32, #tpu.memory_space<vmem>>, vector<8x128xf32>,
    return
  }
  func.func @transform_0(%arg0: i32) -> (i32, i32) {
    %c0_i32 = arith.constant 0 : i32
    %c0_i32_0 = arith.constant 0 : i32
    return %c0_i32, %arg0 : i32, i32
  }
  func.func @transform_1(%arg0: i32) -> (i32, i32) {
    %c0_i32 = arith.constant 0 : i32
    %c0_i32_0 = arith.constant 0 : i32
    %c0_i32_1 = arith.constant 0 : i32
    return %c0_i32, %c0_i32_0 : i32, i32
  }
  func.func @transform_2(%arg0: i32) -> (i32, i32) {
    %c0_i32 = arith.constant 0 : i32
    %c0_i32_0 = arith.constant 0 : i32
    %c0_i32_1 = arith.constant 0 : i32
    return %c0_i32, %c0_i32_0 : i32, i32
  }
  func.func @transform_3(%arg0: i32) -> (i32, i32) {
    %c0_i32 = arith.constant 0 : i32
    %c0_i32_0 = arith.constant 0 : i32
    %c0_i32_1 = arith.constant 0 : i32
    return %c0_i32, %c0_i32_0 : i32, i32
  }
  func.func @transform_4(%arg0: i32) -> (i32, i32) {
    %c0_i32 = arith.constant 0 : i32
    %c0_i32_0 = arith.constant 0 : i32
    %c0_i32_1 = arith.constant 0 : i32
    return %c0_i32, %c0_i32_0 : i32, i32
  }
  func.func @transform_5(%arg0: i32) -> (i32, i32) {
    %c0_i32 = arith.constant 0 : i32
    %c0_i32_0 = arith.constant 0 : i32
    %c0_i32_1 = arith.constant 0 : i32
    return %c0_i32, %c0_i32_0 : i32, i32
  }
  func.func @transform_6(%arg0: i32) -> (i32, i32) {
    %c0_i32 = arith.constant 0 : i32
    %c0_i32_0 = arith.constant 0 : i32
    %c0_i32_1 = arith.constant 0 : i32
    return %c0_i32, %c0_i32_0 : i32, i32
  }
  func.func @transform_7(%arg0: i32) -> (i32, i32) {
    %c0_i32 = arith.constant 0 : i32
    %c0_i32_0 = arith.constant 0 : i32
    return %c0_i32, %arg0 : i32, i32
  }
}

</mosaic_0001>

<bundles_post_ra>
// kernel: tpu_custom_call.1
= control target key start
LH: loop header
LB: loop body
LE: loop exit
PB: predicated region body
PF: predicated region fallthrough
CT: control target
= control target key end

     0   :  { %v1104_v3 = vmov 0   ;;  %s1567_s0 = inlined_call_operand.vmem [shape: bf16[32,128], index: 0, kind: input, shape index: {}]   ;;  %s1568_s1 = inlined_call_operand.vmem [shape: bf16[256,32], index: 1, kind: input, shape index: {}]   ;;  %s1569_s2 = inlined_call_operand.vmem [shape: f32[256,1], index: 2, kind: input, shape index: {}]   ;;  %s1570_s3 = inlined_call_operand.vmem [shape: bf16[128,256], index: 3, kind: input, shape index: {}]   ;;  %s1571_s4 = inlined_call_operand.vmem [shape: f32[128,1], index: 4, kind: input, shape index: {}]   ;;  %s1572_s5 = inlined_call_operand.vmem [shape: bf16[8,128], index: 5, kind: input, shape index: {}]   ;;  %s1573_s6 = inlined_call_operand.vmem [shape: f32[8,1], index: 6, kind: input, shape index: {}]   ;;  %s1574_s7 = inlined_call_operand.hbm [shape: f32[8,128], index: 7, kind: output, shape index: {}]  }
   0x1   :  { %v94_v0 = vld [vmem:[%s1569_s2 + $0xf0] sm:$0xff]  ;;  %v92_v1 = vld [vmem:[%s1569_s2 + $0xe0] sm:$0xff]  ;;  %1077 = vset.pattern.permute.xlu2 %v1104_v3  ;;  %1076 = vset.pattern.permute.xlu1 %v1104_v3  ;;  %v1054_v4 = vld [vmem:[%s1567_s0 + $0x8] sm:$0xff] }
   0x2   :  { %v78_v2 = vld [vmem:[%s1569_s2 + $0x70] sm:$0xff]  ;;  %1075 = vset.pattern.permute.xlu0 %v1104_v3  ;;  %238 = vperm.xlu2 %1077, %v92_v1   ;;  %v1053_v5 = vld [vmem:[%s1567_s0] sm:$0xff]  ;;  %v95_v6 = vld [vmem:[%s1569_s2 + $0xf8] sm:$0xff] }
   0x3   :  { %248 = vperm.xlu0 %1075, %v94_v0   ;;  %168 = vperm.xlu1 %1076, %v78_v2   ;;  %v93_v7 = vld [vmem:[%s1569_s2 + $0xe8] sm:$0xff] }
   0x4   :  { %403 = vmatpush.bf16.msra.mxu0 %v1054_v4  ;;  %1071 = vmatpush.bf16.msra.mxu3 %v1054_v4 }
   0x5   :  { %12 = vsyncpa [#allocation3], 0  ;;  %v79_v8 = vld [vmem:[%s1569_s2 + $0x78] sm:$0xff]  ;;  %v1037_v9 = vld [vmem:[%s1568_s1] sm:$0xff]  ;;  %vm348_vm0 = vcmask 261120   ;;  %s1105_s0 = smov [#allocation2]  }
   0x6   :  { %v1046_v10 = vld [vmem:[%s1568_s1 + $0x48] sm:$0xff]  ;;  %v90_v11 = vld [vmem:[%s1569_s2 + $0xd0] sm:$0xff]  ;;  %v76_v13 = vld [vmem:[%s1569_s2 + $0x60] sm:$0xff]  ;;  %s874_s19 = sshll.u32 %s1105_s0, 4  ;;  %s876_s22 = sshll.u32 %s1574_s7, 4  ;;  %s875_s19 = int_to_ptr.vmem [resolvable:$true] %s874_s19  ;;  %s877_s22 = int_to_ptr.hbm [resolvable:$true] %s876_s22 }
   0x7   :  { %v77_v12 = vld [vmem:[%s1569_s2 + $0x68] sm:$0xff]  ;;  %v91_v14 = vld [vmem:[%s1569_s2 + $0xd8] sm:$0xff]  ;;  %v74_v16 = vld [vmem:[%s1569_s2 + $0x50] sm:$0xff] }
   0x8   :  { %404 = vmatpush.bf16.msra.mxu0 %v1053_v5  ;;  %1072 = vmatpush.bf16.msra.mxu3 %v1053_v5  ;;  %v75_v15 = vld [vmem:[%s1569_s2 + $0x58] sm:$0xff]  ;;  %v1038_v17 = vld [vmem:[%s1568_s1 + $0x8] sm:$0xff]  ;;  %v1047_v18 = vld [vmem:[%s1568_s1 + $0x50] sm:$0xff] }
   0x9   :  { %v72_v19 = vld [vmem:[%s1569_s2 + $0x40] sm:$0xff]  ;;  %v89_v21 = vld [vmem:[%s1569_s2 + $0xc8] sm:$0xff]  ;;  %v86_v22 = vld [vmem:[%s1569_s2 + $0xb0] sm:$0xff] }
   0xa   :  { %243 = vperm.xlu2 %1077, %v93_v7   ;;  %v88_v20 = vld [vmem:[%s1569_s2 + $0xc0] sm:$0xff]  ;;  %v87_v23 = vld [vmem:[%s1569_s2 + $0xb8] sm:$0xff]  ;;  %v73_v24 = vld [vmem:[%s1569_s2 + $0x48] sm:$0xff] }
   0xb   :  { %253 = vperm.xlu0 %1075, %v95_v6   ;;  %173 = vperm.xlu1 %1076, %v79_v8   ;;  %v1039_v25 = vld [vmem:[%s1568_s1 + $0x10] sm:$0xff]  ;;  %v1048_v26 = vld [vmem:[%s1568_s1 + $0x58] sm:$0xff]  ;;  %v84_v27 = vld [vmem:[%s1569_s2 + $0xa0] sm:$0xff] }
   0xc   :  { %957 = vmatmul.msk.bf16.vlgmr.msra.gmra.mxu0 %vm348_vm0, %v1037_v9  ;;  %966 = vmatmul.msk.bf16.vlgmr.msra.gmra.mxu3 %vm348_vm0, %v1046_v10  ;;  %v71_v28 = vld [vmem:[%s1569_s2 + $0x38] sm:$0xff]  ;;  %v70_v29 = vld [vmem:[%s1569_s2 + $0x30] sm:$0xff]  ;;  %v85_v30 = vld [vmem:[%s1569_s2 + $0xa8] sm:$0xff] }
   0xd   :  { %v69_v31 = vld [vmem:[%s1569_s2 + $0x28] sm:$0xff]  ;;  %v68_v32 = vld [vmem:[%s1569_s2 + $0x20] sm:$0xff]  ;;  %v1040_v33 = vld [vmem:[%s1568_s1 + $0x18] sm:$0xff] }
   0xe   :  { %v1049_v34 = vld [vmem:[%s1568_s1 + $0x60] sm:$0xff]  ;;  %v66_v35 = vld [vmem:[%s1569_s2 + $0x10] sm:$0xff]  ;;  %v83_v37 = vld [vmem:[%s1569_s2 + $0x98] sm:$0xff] }
   0xf   :  { %v82_v36 = vld [vmem:[%s1569_s2 + $0x90] sm:$0xff]  ;;  %v80_v38 = vld [vmem:[%s1569_s2 + $0x80] sm:$0xff]  ;;  %v81_v39 = vld [vmem:[%s1569_s2 + $0x88] sm:$0xff] }
  0x10   :  { %v67_v40 = vld [vmem:[%s1569_s2 + $0x18] sm:$0xff]  ;;  %v1041_v41 = vld [vmem:[%s1568_s1 + $0x20] sm:$0xff]  ;;  %v1050_v42 = vld [vmem:[%s1568_s1 + $0x68] sm:$0xff] }
  0x11   :  { %v564_v43 = vld [vmem:[%s1571_s4 + $0x70] sm:$0xff]  ;;  %v65_v44 = vld [vmem:[%s1569_s2 + $0x8] sm:$0xff]  ;;  %v64_v45 = vld [vmem:[%s1569_s2] sm:$0xff] }
  0x12   :  { %228 = vperm.xlu2 %1077, %v90_v11   ;;  %v563_v46 = vld [vmem:[%s1571_s4 + $0x68] sm:$0xff]  ;;  %v562_v47 = vld [vmem:[%s1571_s4 + $0x60] sm:$0xff]  ;;  %v565_v48 = vld [vmem:[%s1571_s4 + $0x78] sm:$0xff] }
  0x13   :  { %163 = vperm.xlu1 %1076, %v77_v12   ;;  %158 = vperm.xlu0 %1075, %v76_v13   ;;  %v1042_v49 = vld [vmem:[%s1568_s1 + $0x28] sm:$0xff]  ;;  %v1051_v50 = vld [vmem:[%s1568_s1 + $0x70] sm:$0xff]  ;;  %v558_v51 = vld [vmem:[%s1571_s4 + $0x40] sm:$0xff] }
  0x14   :  { %v561_v52 = vld [vmem:[%s1571_s4 + $0x58] sm:$0xff]  ;;  %v560_v53 = vld [vmem:[%s1571_s4 + $0x50] sm:$0xff]  ;;  %v559_v57 = vld [vmem:[%s1571_s4 + $0x48] sm:$0xff] }
  0x15   :  { %v557_v54 = vld [vmem:[%s1571_s4 + $0x38] sm:$0xff]  ;;  %v556_v55 = vld [vmem:[%s1571_s4 + $0x30] sm:$0xff]  ;;  %v555_v61 = vld [vmem:[%s1571_s4 + $0x28] sm:$0xff] }
  0x16   :  { %v1043_v58 = vld [vmem:[%s1568_s1 + $0x30] sm:$0xff]  ;;  %v1052_v59 = vld [vmem:[%s1568_s1 + $0x78] sm:$0xff]  ;;  %v554_v62 = vld [vmem:[%s1571_s4 + $0x20] sm:$0xff] }
  0x17   :  { %v552_v60 = vld [vmem:[%s1571_s4 + $0x10] sm:$0xff]  ;;  %v551_v2 = vld [vmem:[%s1571_s4 + $0x8] sm:$0xff]  ;;  %v550_v3 = vld [vmem:[%s1571_s4] sm:$0xff] }
  0x18   :  { %v553_v4 = vld [vmem:[%s1571_s4 + $0x18] sm:$0xff]  ;;  %v849_v9 = vld [vmem:[%s1573_s6] sm:$0xff] }
  0x19   :  { %v1044_v5 = vld [vmem:[%s1568_s1 + $0x38] sm:$0xff]  ;;  %v1045_v13 = vld [vmem:[%s1568_s1 + $0x40] sm:$0xff] }
  0x1a   :  { %153 = vperm.xlu2 %1077, %v75_v15  }
  0x1b   :  { %233 = vperm.xlu0 %1075, %v91_v14   ;;  %148 = vperm.xlu1 %1076, %v74_v16  }
  0x1c   :  { %958 = vmatmul.msk.bf16.gmra.mxu0 %vm348_vm0, %v1038_v17  ;;  %967 = vmatmul.msk.bf16.gmra.mxu3 %vm348_vm0, %v1047_v18 }
  0x22   :  { %138 = vperm.xlu2 %1077, %v72_v19  }
  0x23   :  { %218 = vperm.xlu0 %1075, %v88_v20   ;;  %223 = vperm.xlu1 %1076, %v89_v21  }
  0x2a   :  { %213 = vperm.xlu2 %1077, %v87_v23  }
  0x2b   :  { %208 = vperm.xlu1 %1076, %v86_v22   ;;  %143 = vperm.xlu0 %1075, %v73_v24  }
  0x2c   :  { %959 = vmatmul.msk.bf16.gmra.mxu0 %vm348_vm0, %v1039_v25  ;;  %968 = vmatmul.msk.bf16.gmra.mxu3 %vm348_vm0, %v1048_v26 }
  0x32   :  { %198 = vperm.xlu2 %1077, %v84_v27  }
  0x33   :  { %133 = vperm.xlu1 %1076, %v71_v28   ;;  %128 = vperm.xlu0 %1075, %v70_v29  }
  0x3a   :  { %123 = vperm.xlu2 %1077, %v69_v31  }
  0x3b   :  { %203 = vperm.xlu0 %1075, %v85_v30   ;;  %118 = vperm.xlu1 %1076, %v68_v32  }
  0x3c   :  { %960 = vmatmul.msk.bf16.gmra.mxu0 %vm348_vm0, %v1040_v33  ;;  %969 = vmatmul.msk.bf16.gmra.mxu3 %vm348_vm0, %v1049_v34 }
  0x42   :  { %108 = vperm.xlu2 %1077, %v66_v35  }
  0x43   :  { %188 = vperm.xlu0 %1075, %v82_v36   ;;  %193 = vperm.xlu1 %1076, %v83_v37  }
  0x4a   :  { %183 = vperm.xlu2 %1077, %v81_v39  }
  0x4b   :  { %178 = vperm.xlu1 %1076, %v80_v38   ;;  %113 = vperm.xlu0 %1075, %v67_v40  }
  0x4c   :  { %961 = vmatmul.msk.bf16.gmra.mxu0 %vm348_vm0, %v1041_v41  ;;  %970 = vmatmul.msk.bf16.gmra.mxu3 %vm348_vm0, %v1050_v42 }
  0x52   :  { %638 = vperm.xlu2 %1077, %v564_v43  }
  0x53   :  { %103 = vperm.xlu1 %1076, %v65_v44   ;;  %98 = vperm.xlu0 %1075, %v64_v45  }
  0x5a   :  { %633 = vperm.xlu2 %1077, %v563_v46  }
  0x5b   :  { %628 = vperm.xlu1 %1076, %v562_v47   ;;  %643 = vperm.xlu0 %1075, %v565_v48  }
  0x5c   :  { %962 = vmatmul.msk.bf16.gmra.mxu0 %vm348_vm0, %v1042_v49  ;;  %971 = vmatmul.msk.bf16.gmra.mxu3 %vm348_vm0, %v1051_v50  ;;  %v1323_v56 = vpop.permute.xlu2 %238 }
  0x62   :  { %608 = vperm.xlu2 %1077, %v558_v51  }
  0x63   :  { %623 = vperm.xlu1 %1076, %v561_v52   ;;  %618 = vperm.xlu0 %1075, %v560_v53  }
  0x64   :  { %v1345_v63 = vpop.permute.xlu2 %243 }
  0x6a   :  { %603 = vperm.xlu2 %1077, %v557_v54  }
  0x6b   :  { %598 = vperm.xlu1 %1076, %v556_v55   ;;  %613 = vperm.xlu0 %1075, %v559_v57  }
  0x6c   :  { %963 = vmatmul.msk.bf16.gmra.mxu0 %vm348_vm0, %v1043_v58  ;;  %972 = vmatmul.msk.bf16.gmra.mxu3 %vm348_vm0, %v1052_v59  ;;  %v1363_v6 = vpop.permute.xlu2 %228 }
  0x72   :  { %578 = vperm.xlu2 %1077, %v552_v60  }
  0x73   :  { %593 = vperm.xlu1 %1076, %v555_v61   ;;  %588 = vperm.xlu0 %1075, %v554_v62  }
  0x74   :  { %v1377_v12 = vpop.permute.xlu2 %153 }
  0x75   :  { %v1347_v0 = vpop.permute.xlu0 %248  ;;  %v1349_v1 = vpop.permute.xlu1 %168 }
  0x7a   :  { %573 = vperm.xlu2 %1077, %v551_v2  }
  0x7b   :  { %568 = vperm.xlu1 %1076, %v550_v3   ;;  %583 = vperm.xlu0 %1075, %v553_v4  }
  0x7c   :  { %964 = vmatmul.msk.bf16.gmra.mxu0 %vm348_vm0, %v1044_v5  ;;  %v1389_v18 = vpop.permute.xlu2 %138 }
  0x7d   :  { %v1366_v7 = vpop.permute.xlu0 %253  ;;  %v1368_v8 = vpop.permute.xlu1 %173 }
  0x83   :  { %852 = vperm.xlu0 %1075, %v849_v9  }
  0x84   :  { %v214_v24 = vpop.permute.xlu2 %213 }
  0x85   :  { %v1373_v10 = vpop.permute.xlu1 %163  ;;  %v1375_v11 = vpop.permute.xlu0 %158 }
  0x89   :  { %v1382_v14 = vpop.f32.mrf.mxu0 }
  0x8c   :  { %965 = vmatmul.msk.bf16.gmra.mxu0 %vm348_vm0, %v1045_v13  ;;  %v199_v29 = vpop.permute.xlu2 %198 }
  0x8d   :  { %v1385_v15 = vpop.permute.xlu0 %233  ;;  %v1387_v16 = vpop.permute.xlu1 %148 }
  0x8f   :  { %v451_v17 = vpop.f32.mrf.mxu3 }
  0x91   :  { %v408_v19 = vpop.f32.mrf.mxu0 }
  0x94   :  { %v124_v38 = vpop.permute.xlu2 %123 }
  0x95   :  { %v1391_v20 = vpop.permute.xlu0 %218  ;;  %v1393_v21 = vpop.permute.xlu1 %223 }
  0x97   :  { %v453_v22 = vpop.f32.mrf.mxu3 }
  0x99   :  { %v411_v23 = vpop.f32.mrf.mxu0 }
  0x9c   :  { %v109_v59 = vpop.permute.xlu2 %108 }
  0x9d   :  { %v209_v25 = vpop.permute.xlu1 %208  ;;  %v1395_v26 = vpop.permute.xlu0 %143  ;;  %v412_v3 = vadd.f32 %v411_v23, %v109_v59 }
  0x9f   :  { %v456_v27 = vpop.f32.mrf.mxu3 }
  0xa0   :  { %v457_v34 = vadd.f32 %v456_v27, %v199_v29 }
  0xa1   :  { %v413_v28 = vpop.f32.mrf.mxu0 }
  0xa2   :  { %v506_v40 = vmax.f32 %v457_v34, 0.0 }
  0xa5   :  { %v134_v30 = vpop.permute.xlu1 %133  ;;  %v129_v31 = vpop.permute.xlu0 %128 }
  0xa7   :  { %v458_v32 = vpop.f32.mrf.mxu3 }
  0xa9   :  { %v416_v33 = vpop.f32.mrf.mxu0 }
  0xad   :  { %v204_v35 = vpop.permute.xlu0 %203  ;;  %v119_v36 = vpop.permute.xlu1 %118 }
  0xae   :  { %v459_v37 = vadd.f32 %v458_v32, %v204_v35  ;;  %v417_v42 = vadd.f32 %v416_v33, %v119_v36 }
  0xaf   :  { %v461_v39 = vpop.f32.mrf.mxu3 }
  0xb0   :  { %v507_v41 = vmax.f32 %v459_v37, 0.0  ;;  %v490_v46 = vmax.f32 %v417_v42, 0.0  ;;  %v462_v50 = vadd.f32 %v461_v39, %v209_v25 }
  0xb1   :  { %v418_v43 = vpop.f32.mrf.mxu0 }
  0xb2   :  { %v419_v44 = vadd.f32 %v418_v43, %v124_v38  ;;  %v1397_v45 = vpack.c.bf16 %v507_v41, %v506_v40  ;;  %v508_v61 = vmax.f32 %v462_v50, 0.0 }
  0xb4   :  { %v491_v47 = vmax.f32 %v419_v44, 0.0 }
  0xb5   :  { %v189_v48 = vpop.permute.xlu0 %188  ;;  %v194_v49 = vpop.permute.xlu1 %193 }
  0xb6   :  { %v452_v51 = vadd.f32 %v451_v17, %v189_v48  ;;  %v454_v52 = vadd.f32 %v453_v22, %v194_v49  ;;  %v1399_v53 = vpack.c.bf16 %v491_v47, %v490_v46  ;;  %v488_v22 = vmax.f32 %v412_v3, 0.0 }
  0xb7   :  { %v463_v54 = vpop.f32.mrf.mxu3 }
  0xb8   :  { %v504_v55 = vmax.f32 %v452_v51, 0.0  ;;  %v505_v57 = vmax.f32 %v454_v52, 0.0  ;;  %v464_v58 = vadd.f32 %v463_v54, %v214_v24 }
  0xb9   :  { %v421_v60 = vpop.f32.mrf.mxu0 }
  0xba   :  { %v509_v62 = vmax.f32 %v464_v58, 0.0  ;;  %v1401_v2 = vpack.c.bf16 %v505_v57, %v504_v55  ;;  %v422_v25 = vadd.f32 %v421_v60, %v129_v31 }
  0xbc   :  { %v1403_v4 = vpack.c.bf16 %v509_v62, %v508_v61  ;;  %v492_v33 = vmax.f32 %v422_v25, 0.0 }
  0xbd   :  { %v1405_v5 = vpop.permute.xlu1 %178  ;;  %v114_v9 = vpop.permute.xlu0 %113 }
  0xbe   :  { %v414_v13 = vadd.f32 %v413_v28, %v114_v9 }
  0xbf   :  { %v466_v17 = vpop.f32.mrf.mxu3 }
  0xc0   :  { %v489_v27 = vmax.f32 %v414_v13, 0.0  ;;  %v467_v25 = vadd.f32 %v466_v17, %v1391_v20 }
  0xc1   :  { %v423_v29 = vpop.f32.mrf.mxu0 }
  0xc2   :  { %v424_v32 = vadd.f32 %v423_v29, %v134_v30  ;;  %v1407_v24 = vpack.c.bf16 %v489_v27, %v488_v22 }
  0xc4   :  { %v493_v34 = vmax.f32 %v424_v32, 0.0 }
  0xc5   :  { %v104_v35 = vpop.permute.xlu1 %103  ;;  %v99_v36 = vpop.permute.xlu0 %98 }
  0xc6   :  { %v409_v37 = vadd.f32 %v408_v19, %v104_v35  ;;  %v407_v23 = vadd.f32 %v1382_v14, %v99_v36  ;;  %v1410_v38 = vpack.c.bf16 %v493_v34, %v492_v33 }
  0xc7   :  { %v468_v39 = vpop.f32.mrf.mxu3 }
  0xc8   :  { %v487_v40 = vmax.f32 %v409_v37, 0.0  ;;  %v486_v28 = vmax.f32 %v407_v23, 0.0 }
  0xc9   :  { %v426_v41 = vpop.f32.mrf.mxu0 }
  0xca   :  { %v1412_v42 = vpack.c.bf16 %v487_v40, %v486_v28 }
  0xcf   :  { %v471_v31 = vpop.f32.mrf.mxu3 }
  0xd0   :  { %v472_v3 = vadd.f32 %v471_v31, %v1363_v6 }
  0xd1   :  { %v428_v43 = vpop.f32.mrf.mxu0 }
  0xd7   :  { %v473_v30 = vpop.f32.mrf.mxu3 }
  0xd8   :  { %v474_v60 = vadd.f32 %v473_v30, %v1385_v15 }
  0xd9   :  { %v431_v44 = vpop.f32.mrf.mxu0 }
  0xda   :  { %v513_v13 = vmax.f32 %v474_v60, 0.0  ;;  %v432_v20 = vadd.f32 %v431_v44, %v1387_v16  ;;  %v184_v16 = vpop.permute.xlu2 %183  ;;  %v999_v60 = vld [vmem:[%s1570_s3 + $0x30] sm:$0xf] }
  0xdc   :  { %v496_v40 = vmax.f32 %v432_v20, 0.0 }
  0xdf   :  { %v476_v46 = vpop.f32.mrf.mxu3 }
  0xe0   :  { %v477_v57 = vadd.f32 %v476_v46, %v1323_v56  ;;  %v512_v56 = vmax.f32 %v472_v3, 0.0  ;;  %v1063_v3 = vld [vmem:[%s1570_s3 + $0x44] sm:$0xf] }
  0xe1   :  { %v433_v47 = vpop.f32.mrf.mxu0 }
  0xe2   :  { %v514_v9 = vmax.f32 %v477_v57, 0.0  ;;  %v547_v34 = vpack.c.bf16 %v513_v13, %v512_v56  ;;  %v434_v35 = vadd.f32 %v433_v47, %v1377_v12  ;;  %v1061_v57 = vld [vmem:[%s1570_s3 + $0x34] sm:$0xf]  ;;  %v1007_v13 = vld [vmem:[%s1570_s3 + $0x40] sm:$0xf] }
  0xe4   :  { %v497_v23 = vmax.f32 %v434_v35, 0.0  ;;  %v1023_v35 = vld [vmem:[%s1570_s3 + $0x60] sm:$0xf] }
  0xe6   :  { %v539_v12 = vpack.c.bf16 %v497_v23, %v496_v40  ;;  %v1070_v40 = vld [vmem:[%s1570_s3 + $0x74] sm:$0xf0] }
  0xe7   :  { %v478_v48 = vpop.f32.mrf.mxu3 }
  0xe8   :  { %v479_v52 = vadd.f32 %v478_v48, %v1345_v63 }
  0xe9   :  { %v436_v49 = vpop.f32.mrf.mxu0 }
  0xea   :  { %v515_v61 = vmax.f32 %v479_v52, 0.0  ;;  %v437_v6 = vadd.f32 %v436_v49, %v1375_v11  ;;  %v983_v49 = vld [vmem:[%s1570_s3 + $0x10] sm:$0xf]  ;;  %v991_v52 = vld [vmem:[%s1570_s3 + $0x20] sm:$0xf] }
  0xec   :  { %v548_v22 = vpack.c.bf16 %v515_v61, %v514_v9  ;;  %v498_v17 = vmax.f32 %v437_v6, 0.0  ;;  %v1062_v61 = vld [vmem:[%s1570_s3 + $0x34] sm:$0xf0]  ;;  %v1009_v9 = vld [vmem:[%s1570_s3 + $0x48] sm:$0xf0] }
  0xed   :  { %v1067_v6 = vld [vmem:[%s1570_s3 + $0x64] sm:$0xf] }
  0xef   :  { %v481_v50 = vpop.f32.mrf.mxu3 }
  0xf0   :  { %v482_v14 = vadd.f32 %v481_v50, %v1347_v0  ;;  %v469_v0 = vadd.f32 %v468_v39, %v1393_v21  ;;  %v510_v21 = vmax.f32 %v467_v25, 0.0  ;;  %v427_v39 = vadd.f32 %v426_v41, %v1389_v18  ;;  %v1055_v18 = vld [vmem:[%s1570_s3 + $0x4] sm:$0xf]  ;;  %v1058_v50 = vld [vmem:[%s1570_s3 + $0x14] sm:$0xf0] }
  0xf1   :  { %v438_v19 = vpop.f32.mrf.mxu0  ;;  %v1017_v25 = vld [vmem:[%s1570_s3 + $0x58] sm:$0xf0] }
  0xf2   :  { %v516_v58 = vmax.f32 %v482_v14, 0.0  ;;  %v439_v27 = vadd.f32 %v438_v19, %v1373_v10  ;;  %v511_v29 = vmax.f32 %v469_v0, 0.0  ;;  %v494_v31 = vmax.f32 %v427_v39, 0.0  ;;  %v1059_v19 = vld [vmem:[%s1570_s3 + $0x24] sm:$0xf] }
  0xf3   :  { %v993_v14 = vld [vmem:[%s1570_s3 + $0x28] sm:$0xf0]  ;;  %v1012_v0 = vor.u32 %v1063_v3, %v1009_v9  ;;  %v1031_v39 = vld [vmem:[%s1570_s3 + $0x70] sm:$0xf] }
  0xf4   :  { %v546_v10 = vpack.c.bf16 %v511_v29, %v510_v21  ;;  %v1518_v21 = vpop.permute.xlu1 %628 }
  0xf7   :  { %v483_v51 = vpop.f32.mrf.mxu3 }
  0xf8   :  { %v484_v54 = vadd.f32 %v483_v51, %v1366_v7  ;;  %v996_v51 = vor.u32 %v1059_v19, %v993_v14 }
  0xf9   :  { %v441_v55 = vpop.f32.mrf.mxu0 }
  0xfa   :  { %v517_v59 = vmax.f32 %v484_v54, 0.0  ;;  %v442_v63 = vadd.f32 %v441_v55, %v1349_v1  ;;  %v499_v1 = vmax.f32 %v439_v27, 0.0  ;;  %v1060_v54 = vld [vmem:[%s1570_s3 + $0x24] sm:$0xf0]  ;;  %v1015_v27 = vld [vmem:[%s1570_s3 + $0x50] sm:$0xf] }
  0xfb   :  { %v992_v55 = vor.u32 %v1060_v54, %v991_v52 }
  0xfc   :  { %v549_v62 = vpack.c.bf16 %v517_v59, %v516_v58  ;;  %v500_v32 = vmax.f32 %v442_v63, 0.0  ;;  %v540_v11 = vpack.c.bf16 %v499_v1, %v498_v17  ;;  %v1001_v58 = vld [vmem:[%s1570_s3 + $0x38] sm:$0xf0]  ;;  %v1064_v63 = vld [vmem:[%s1570_s3 + $0x44] sm:$0xf0]  ;;  %v1528_v17 = vpop.permute.xlu1 %623 }
  0xfd   :  { %v1004_v59 = vor.u32 %v1061_v57, %v1001_v58  ;;  %v1068_v1 = vld [vmem:[%s1570_s3 + $0x64] sm:$0xf0] }
  0xfe   :  { %775 = vmatpush.bf16.msra.mxu2 %v549_v62  ;;  %v1000_v62 = vor.u32 %v1062_v61, %v999_v60 }
 0x101   :  { %v443_v7 = vpop.f32.mrf.mxu0 }
 0x102   :  { %v444_v15 = vadd.f32 %v443_v7, %v1368_v8  ;;  %776 = vmatpush.bf16.msra.mxu2 %v548_v22  ;;  %v429_v8 = vadd.f32 %v428_v43, %v1395_v26  ;;  %v1008_v22 = vor.u32 %v1064_v63, %v1007_v13  ;;  %v1065_v7 = vld [vmem:[%s1570_s3 + $0x54] sm:$0xf] }
 0x103   :  { %v1020_v56 = vor.u32 %v1065_v7, %v1017_v25 }
 0x104   :  { %v501_v33 = vmax.f32 %v444_v15, 0.0  ;;  %v495_v28 = vmax.f32 %v429_v8, 0.0  ;;  %v1066_v15 = vld [vmem:[%s1570_s3 + $0x54] sm:$0xf0] }
 0x105   :  { %v1016_v29 = vor.u32 %v1066_v15, %v1015_v27 }
 0x106   :  { %777 = vmatpush.bf16.msra.mxu2 %v547_v34  ;;  %v541_v36 = vpack.c.bf16 %v501_v33, %v500_v32  ;;  %v538_v26 = vpack.c.bf16 %v495_v28, %v494_v31  ;;  %v1025_v32 = vld [vmem:[%s1570_s3 + $0x68] sm:$0xf0]  ;;  %v1516_v34 = vpop.permute.xlu2 %638  ;;  %v1032_v28 = vor.u32 %v1070_v40, %v1031_v39 }
 0x107   :  { %v1028_v33 = vor.u32 %v1067_v6, %v1025_v32 }
 0x108   :  { %726 = vmatpush.bf16.msra.mxu1 %v541_v36  ;;  %v1024_v36 = vor.u32 %v1068_v1, %v1023_v35 }
 0x109   :  { %v446_v37 = vpop.f32.mrf.mxu0 }
 0x10a   :  { %778 = vmatpush.bf16.msra.mxu2 %v546_v10  ;;  %v447_v44 = vadd.f32 %v446_v37, %v1405_v5  ;;  %v1069_v10 = vld [vmem:[%s1570_s3 + $0x74] sm:$0xf]  ;;  %v1033_v37 = vld [vmem:[%s1570_s3 + $0x78] sm:$0xf0] }
 0x10b   :  { %v1036_v8 = vor.u32 %v1069_v10, %v1033_v37 }
 0x10c   :  { %727 = vmatpush.bf16.msra.mxu1 %v540_v11  ;;  %v502_v47 = vmax.f32 %v447_v44, 0.0  ;;  %v599_v11 = vpop.permute.xlu1 %598 }
 0x10e   :  { %779 = vmatpush.bf16.msra.mxu2 %v1403_v4  ;;  %v977_v4 = vld [vmem:[%s1570_s3 + $0x8] sm:$0xf0]  ;;  %v1526_v20 = vpop.permute.xlu2 %633 }
 0x10f   :  { %v980_v41 = vor.u32 %v1055_v18, %v977_v4 }
 0x110   :  { %728 = vmatpush.bf16.msra.mxu1 %v539_v12  ;;  %v1542_v12 = vpop.permute.xlu0 %643 }
 0x111   :  { %v448_v30 = vpop.f32.mrf.mxu0 }
 0x112   :  { %v449_v46 = vadd.f32 %v448_v30, %v184_v16  ;;  %780 = vmatpush.bf16.msra.mxu2 %v1397_v45  ;;  %v975_v45 = vld [vmem:[%s1570_s3] sm:$0xf] }
 0x114   :  { %v503_v43 = vmax.f32 %v449_v46, 0.0  ;;  %729 = vmatpush.bf16.msra.mxu1 %v538_v26  ;;  %v594_v16 = vpop.permute.xlu1 %593 }
 0x116   :  { %781 = vmatpush.bf16.msra.mxu2 %v1401_v2  ;;  %v542_v5 = vpack.c.bf16 %v503_v43, %v502_v47  ;;  %v1056_v2 = vld [vmem:[%s1570_s3 + $0x4] sm:$0xf0]  ;;  %v609_v23 = vpop.permute.xlu2 %608 }
 0x117   :  { %v976_v48 = vor.u32 %v1056_v2, %v975_v45 }
 0x118   :  { %730 = vmatpush.bf16.msra.mxu1 %v1410_v38  ;;  %v1057_v38 = vld [vmem:[%s1570_s3 + $0x14] sm:$0xf]  ;;  %v1544_v30 = vpop.permute.xlu0 %618 }
 0x11a   :  { %782 = vmatpush.bf16.msra.mxu2 %v542_v5 }
 0x11c   :  { %731 = vmatpush.bf16.msra.mxu1 %v1399_v53  ;;  %v985_v53 = vld [vmem:[%s1570_s3 + $0x18] sm:$0xf0]  ;;  %v569_v26 = vpop.permute.xlu1 %568 }
 0x11d   :  { %783 = vmatmul.bf16.vlgmr.msra.gmra.mxu2 %v980_v41 }
 0x11e   :  { %v604_v31 = vpop.permute.xlu2 %603 }
 0x120   :  { %732 = vmatpush.bf16.msra.mxu1 %v1407_v24  ;;  %v988_v24 = vor.u32 %v1057_v38, %v985_v53  ;;  %v1546_v4 = vpop.permute.xlu0 %613 }
 0x124   :  { %733 = vmatpush.bf16.msra.mxu1 %v1412_v42  ;;  %v984_v42 = vor.u32 %v1058_v50, %v983_v49 }
 0x126   :  { %v579_v46 = vpop.permute.xlu2 %578 }
 0x127   :  { %734 = vmatmul.bf16.vlgmr.msra.gmra.mxu1 %v976_v48 }
 0x128   :  { %v589_v49 = vpop.permute.xlu0 %588 }
 0x12d   :  { %788 = vmatmul.bf16.gmra.mxu2 %v988_v24 }
 0x12e   :  { %v574_v41 = vpop.permute.xlu2 %573 }
 0x130   :  { %v584_v52 = vpop.permute.xlu0 %583 }
 0x137   :  { %739 = vmatmul.bf16.gmra.mxu1 %v984_v42 }
 0x13d   :  { %793 = vmatmul.bf16.gmra.mxu2 %v996_v51 }
 0x147   :  { %744 = vmatmul.bf16.gmra.mxu1 %v992_v55 }
 0x14d   :  { %798 = vmatmul.bf16.gmra.mxu2 %v1004_v59 }
 0x157   :  { %749 = vmatmul.bf16.gmra.mxu1 %v1000_v62 }
 0x15d   :  { %803 = vmatmul.bf16.gmra.mxu2 %v1012_v0 }
 0x167   :  { %754 = vmatmul.bf16.gmra.mxu1 %v1008_v22 }
 0x16d   :  { %808 = vmatmul.bf16.gmra.mxu2 %v1020_v56 }
 0x177   :  { %759 = vmatmul.bf16.gmra.mxu1 %v1016_v29 }
 0x17d   :  { %813 = vmatmul.bf16.gmra.mxu2 %v1028_v33 }
 0x187   :  { %764 = vmatmul.bf16.gmra.mxu1 %v1024_v36 }
 0x18d   :  { %818 = vmatmul.bf16.gmra.mxu2 %v1036_v8 }
 0x197   :  { %769 = vmatmul.bf16.gmra.mxu1 %v1032_v28 }
 0x1a0   :  { %v784_v44 = vpop.f32.mrf.mxu2 }
 0x1a4   :  { %v735_v43 = vpop.f32.mrf.mxu1 }
 0x1a5   :  { %v736_v47 = vadd.f32 %v735_v43, %v569_v26 }
 0x1a7   :  { %v785_v18 = vadd.f32 %v784_v44, %v736_v47 }
 0x1a8   :  { %v786_v5 = vpop.f32.mrf.mxu2 }
 0x1a9   :  { %v824_v53 = vmax.f32 %v785_v18, 0.0 }
 0x1ac   :  { %v737_v45 = vpop.f32.mrf.mxu1 }
 0x1ad   :  { %v738_v2 = vadd.f32 %v737_v45, %v574_v41 }
 0x1af   :  { %v787_v48 = vadd.f32 %v786_v5, %v738_v2 }
 0x1b0   :  { %v789_v38 = vpop.f32.mrf.mxu2 }
 0x1b1   :  { %v825_v24 = vmax.f32 %v787_v48, 0.0 }
 0x1b3   :  { %v1548_v50 = vpack.c.bf16 %v825_v24, %v824_v53 }
 0x1b4   :  { %v740_v42 = vpop.f32.mrf.mxu1 }
 0x1b5   :  { %v741_v19 = vadd.f32 %v740_v42, %v579_v46 }
 0x1b7   :  { %v790_v14 = vadd.f32 %v789_v38, %v741_v19 }
 0x1b8   :  { %v791_v51 = vpop.f32.mrf.mxu2 }
 0x1b9   :  { %v826_v59 = vmax.f32 %v790_v14, 0.0 }
 0x1bc   :  { %v742_v54 = vpop.f32.mrf.mxu1 }
 0x1bd   :  { %v743_v55 = vadd.f32 %v742_v54, %v584_v52 }
 0x1bf   :  { %v792_v57 = vadd.f32 %v791_v51, %v743_v55 }
 0x1c0   :  { %v794_v58 = vpop.f32.mrf.mxu2 }
 0x1c1   :  { %v827_v60 = vmax.f32 %v792_v57, 0.0 }
 0x1c3   :  { %v1550_v61 = vpack.c.bf16 %v827_v60, %v826_v59 }
 0x1c4   :  { %v745_v62 = vpop.f32.mrf.mxu1 }
 0x1c5   :  { %v746_v3 = vadd.f32 %v745_v62, %v589_v49 }
 0x1c7   :  { %v795_v9 = vadd.f32 %v794_v58, %v746_v3 }
 0x1c8   :  { %v796_v0 = vpop.f32.mrf.mxu2 }
 0x1c9   :  { %v828_v25 = vmax.f32 %v795_v9, 0.0 }
 0x1cc   :  { %v747_v13 = vpop.f32.mrf.mxu1 }
 0x1cd   :  { %v748_v63 = vadd.f32 %v747_v13, %v594_v16  ;;  %v853_v13 = vpop.permute.xlu0 %852 }
 0x1cf   :  { %v797_v22 = vadd.f32 %v796_v0, %v748_v63 }
 0x1d0   :  { %v799_v7 = vpop.f32.mrf.mxu2 }
 0x1d1   :  { %v829_v56 = vmax.f32 %v797_v22, 0.0 }
 0x1d3   :  { %v843_v27 = vpack.c.bf16 %v829_v56, %v828_v25 }
 0x1d4   :  { %v750_v15 = vpop.f32.mrf.mxu1 }
 0x1d5   :  { %v751_v29 = vadd.f32 %v750_v15, %v599_v11 }
 0x1d7   :  { %v800_v6 = vadd.f32 %v799_v7, %v751_v29 }
 0x1d8   :  { %v801_v32 = vpop.f32.mrf.mxu2 }
 0x1d9   :  { %v830_v10 = vmax.f32 %v800_v6, 0.0 }
 0x1dc   :  { %v752_v33 = vpop.f32.mrf.mxu1 }
 0x1dd   :  { %v753_v35 = vadd.f32 %v752_v33, %v604_v31 }
 0x1df   :  { %v802_v1 = vadd.f32 %v801_v32, %v753_v35 }
 0x1e0   :  { %v804_v36 = vpop.f32.mrf.mxu2 }
 0x1e1   :  { %v831_v37 = vmax.f32 %v802_v1, 0.0 }
 0x1e3   :  { %v844_v8 = vpack.c.bf16 %v831_v37, %v830_v10 }
 0x1e4   :  { %v755_v39 = vpop.f32.mrf.mxu1 }
 0x1e5   :  { %v756_v40 = vadd.f32 %v755_v39, %v609_v23 }
 0x1e7   :  { %v805_v28 = vadd.f32 %v804_v36, %v756_v40 }
 0x1e8   :  { %v806_v16 = vpop.f32.mrf.mxu2 }
 0x1e9   :  { %v832_v0 = vmax.f32 %v805_v28, 0.0 }
 0x1ec   :  { %v757_v44 = vpop.f32.mrf.mxu1 }
 0x1f0   :  { %v809_v46 = vpop.f32.mrf.mxu2 }
 0x1f4   :  { %v760_v26 = vpop.f32.mrf.mxu1 }
 0x1f5   :  { %v761_v51 = vadd.f32 %v760_v26, %v1544_v30 }
 0x1f7   :  { %v810_v59 = vadd.f32 %v809_v46, %v761_v51 }
 0x1f8   :  { %v811_v43 = vpop.f32.mrf.mxu2 }
 0x1f9   :  { %v834_v3 = vmax.f32 %v810_v59, 0.0 }
 0x1fc   :  { %v762_v47 = vpop.f32.mrf.mxu1 }
 0x1fd   :  { %v763_v42 = vadd.f32 %v762_v47, %v1528_v17 }
 0x1ff   :  { %v812_v57 = vadd.f32 %v811_v43, %v763_v42 }
 0x200   :  { %v814_v18 = vpop.f32.mrf.mxu2 }
 0x204   :  { %v765_v11 = vpop.f32.mrf.mxu1 }
 0x205   :  { %v766_v23 = vadd.f32 %v765_v11, %v1518_v21 }
 0x207   :  { %v815_v52 = vadd.f32 %v814_v18, %v766_v23 }
 0x208   :  { %v816_v5 = vpop.f32.mrf.mxu2 }
 0x209   :  { %v836_v21 = vmax.f32 %v815_v52, 0.0 }
 0x20c   :  { %v767_v41 = vpop.f32.mrf.mxu1 }
 0x20d   :  { %v768_v48 = vadd.f32 %v767_v41, %v1526_v20 }
 0x20f   :  { %v817_v19 = vadd.f32 %v816_v5, %v768_v48 }
 0x210   :  { %v819_v45 = vpop.f32.mrf.mxu2 }
 0x211   :  { %v837_v20 = vmax.f32 %v817_v19, 0.0 }
 0x213   :  { %v847_v62 = vpack.c.bf16 %v837_v20, %v836_v21 }
 0x214   :  { %v770_v31 = vpop.f32.mrf.mxu1 }
 0x215   :  { %v771_v2 = vadd.f32 %v770_v31, %v1516_v34  ;;  %v758_v34 = vadd.f32 %v757_v44, %v1546_v4  ;;  %v840_v4 = vld [vmem:[%s1572_s5] sm:$0xf] }
 0x217   :  { %v820_v53 = vadd.f32 %v819_v45, %v771_v2  ;;  %v807_v60 = vadd.f32 %v806_v16, %v758_v34 }
 0x218   :  { %v821_v49 = vpop.f32.mrf.mxu2 }
 0x219   :  { %v838_v54 = vmax.f32 %v820_v53, 0.0  ;;  %v833_v17 = vmax.f32 %v807_v60, 0.0 }
 0x21b   :  { %v845_v30 = vpack.c.bf16 %v833_v17, %v832_v0 }
 0x21c   :  { %v772_v38 = vpop.f32.mrf.mxu1 }
 0x21d   :  { %v773_v24 = vadd.f32 %v772_v38, %v1542_v12  ;;  %v835_v12 = vmax.f32 %v812_v57, 0.0 }
 0x21f   :  { %v822_v14 = vadd.f32 %v821_v49, %v773_v24  ;;  %v846_v9 = vpack.c.bf16 %v835_v12, %v834_v3 }
 0x221   :  { %v839_v55 = vmax.f32 %v822_v14, 0.0 }
 0x223   :  { %v848_v58 = vpack.c.bf16 %v839_v55, %v838_v54 }
 0x225   :  { %855 = vmatpush.bf16.msrb.mxu3 %v848_v58 }
 0x229   :  { %856 = vmatpush.bf16.msrb.mxu3 %v847_v62 }
 0x22d   :  { %857 = vmatpush.bf16.msrb.mxu3 %v846_v9 }
 0x231   :  { %858 = vmatpush.bf16.msrb.mxu3 %v845_v30 }
 0x235   :  { %859 = vmatpush.bf16.msrb.mxu3 %v844_v8 }
 0x239   :  { %860 = vmatpush.bf16.msrb.mxu3 %v843_v27 }
 0x23d   :  { %861 = vmatpush.bf16.msrb.mxu3 %v1550_v61 }
 0x241   :  { %862 = vmatpush.bf16.msrb.mxu3 %v1548_v50 }
 0x244   :  { %863 = vmatmul.bf16.vlgmr.msrb.gmra.mxu3 %v840_v4 }
 0x2c7   :  { %v864_v63 = vpop.f32.mrf.mxu3 }
 0x2c8   :  { %v865_v22 = vadd.f32 %v864_v63, %v853_v13 }
 0x2ca   :  { %868 = vst [vmem:[#allocation2] sm:$0xff] %v865_v22 }
 0x2cb   :  { %879 = dma.vmem_to_hbm [thread:$0]  %s875_s19, 128, %s877_s22, [#allocation3]  }
 0x2cf   :  { %v866_v61 = vpop.f32.mrf.mxu3 }
 0x2d0   :  { %1102 = dma.done.wait [#allocation3], 128  }
 0x2d1   :  { %1103 = vsyncadd [#allocation3], 4294967168 }
 0x2d2   :  { %884 = vsyncpa [#allocation3], 1 }

</bundles_post_ra>
